<compile_context>
chip_gen: v5e
topology: v5e:2x2
jax: 0.10.0
libtpu: 0.0.40
codegen_flags: <defaults>
</compile_context>

<pallas_src>
import functools

import jax
import jax.numpy as jnp
from jax.experimental import pallas as pl
from jax.experimental.pallas import tpu as pltpu


def _round_up(n, m):
    return ((n + m - 1) // m) * m


# ---------------------------------------------------------------------------
# Kernel 1: generic row-tiled projection  y = a @ w   (parallel grid).
# Used for both loop-independent matmuls (x @ Wi^T and rnn_out @ Wo^T).
# ---------------------------------------------------------------------------
def _projection_kernel(a_ref, w_ref, o_ref):
    a = a_ref[...].astype(w_ref.dtype)            # optional bf16 MXU operands
    o_ref[...] = jnp.dot(
        a, w_ref[...], preferred_element_type=jnp.float32
    ).astype(o_ref.dtype)


def _project(a, w, *, row_block=256):
    """a: (N, K) f32, w: (K, M) -> (N, M) f32.  N is a multiple of 8."""
    N, K = a.shape
    M = w.shape[1]
    tn = min(row_block, N)
    Np = _round_up(N, tn)
    if Np != N:
        a = jnp.pad(a, ((0, Np - N), (0, 0)))
    out = pl.pallas_call(
        _projection_kernel,
        out_shape=jax.ShapeDtypeStruct((Np, M), jnp.float32),
        grid_spec=pltpu.PrefetchScalarGridSpec(
            num_scalar_prefetch=0,
            grid=(Np // tn,),
            in_specs=[
                pl.BlockSpec((tn, K), lambda i: (i, 0)),
                pl.BlockSpec((K, M), lambda i: (0, 0)),   # resident weight
            ],
            out_specs=pl.BlockSpec((tn, M), lambda i: (i, 0)),
        ),
        compiler_params=pltpu.CompilerParams(
            dimension_semantics=("parallel",),            # megacore-shardable
        ),
    )(a, w)
    return out[:N]


# ---------------------------------------------------------------------------
# Kernel 2: serial recurrence over time, chunked T steps per grid iteration.
# ---------------------------------------------------------------------------
def _recurrence_kernel(xproj_ref, wh_ref, rnn_out_ref, h_scratch):
    """One grid step processes a chunk of T time steps.

    xproj_ref:   (T, Bp, Hp)  precomputed x @ Wi^T for this chunk (f32)
    wh_ref:      (Hp, Hp)     recurrent weight (resident across the grid)
    rnn_out_ref: (T, Bp, Hp)  hidden states for this chunk
    h_scratch:   (Bp, Hp)     carried hidden state (persists across grid steps)
    """
    @pl.when(pl.program_id(0) == 0)
    def _():
        h_scratch[...] = jnp.zeros_like(h_scratch)   # RNNLayer.init_hidden()

    wh = wh_ref[...]                                 # load once per chunk
    T = xproj_ref.shape[0]

    def step(t, h):
        # Single MXU contraction per step; x-projection was precomputed.
        pre = xproj_ref[t] + jnp.dot(
            h.astype(wh.dtype), wh, preferred_element_type=jnp.float32
        )
        h_new = jnp.tanh(pre)                        # tanh / carry stay in f32
        rnn_out_ref[t] = h_new.astype(rnn_out_ref.dtype)
        return h_new

    h_final = jax.lax.fori_loop(0, T, step, h_scratch[...], unroll=True)
    h_scratch[...] = h_final


# ---------------------------------------------------------------------------
# Forward wrapper (matches RNNNet.forward semantics).
# ---------------------------------------------------------------------------
@functools.partial(jax.jit, static_argnames=("matmul_dtype", "t_chunk"))
def rnn_net_forward(x, w_i2h, w_h2h, w_fc, *, matmul_dtype=jnp.float32,
                    t_chunk=8):
    """x: (S, B, I); w_i2h: (H, I); w_h2h: (H, H); w_fc: (O, H) (PyTorch layout)."""
    S, B, I = x.shape
    H = w_i2h.shape[0]
    O = w_fc.shape[0]

    # Lane/sublane-dense padded sizes.
    Bp = _round_up(B, 8)
    Hp = _round_up(H, 128)
    Op = _round_up(O, 128)
    T = max(1, min(t_chunk, S))
    Sp = _round_up(S, T)

    # Pre-transpose + zero-pad weights.  Zero padding is exact: padded hidden
    # columns remain exactly 0 through the recurrence and the fc.
    wi_t = jnp.pad(w_i2h.T, ((0, 0), (0, Hp - H))).astype(matmul_dtype)       # (I, Hp)
    wh_t = jnp.pad(w_h2h.T, ((0, Hp - H), (0, Hp - H))).astype(matmul_dtype)  # (Hp, Hp)
    wo_t = jnp.pad(w_fc.T, ((0, Hp - H), (0, Op - O))).astype(matmul_dtype)   # (Hp, Op)

    xp = jnp.pad(x, ((0, Sp - S), (0, Bp - B), (0, 0)))                       # (Sp, Bp, I)

    # (1) Input projection hoisted out of the serial loop: one parallel matmul.
    x_proj = _project(xp.reshape(Sp * Bp, I), wi_t).reshape(Sp, Bp, Hp)

    # (2) Serial recurrence over chunks of T time steps.
    rnn_out_p = pl.pallas_call(
        _recurrence_kernel,
        out_shape=jax.ShapeDtypeStruct((Sp, Bp, Hp), jnp.float32),
        grid_spec=pltpu.PrefetchScalarGridSpec(
            num_scalar_prefetch=0,
            grid=(Sp // T,),
            in_specs=[
                pl.BlockSpec((T, Bp, Hp), lambda c: (c, 0, 0)),   # x_proj chunk
                pl.BlockSpec((Hp, Hp), lambda c: (0, 0)),         # Wh resident
            ],
            out_specs=pl.BlockSpec((T, Bp, Hp), lambda c: (c, 0, 0)),
            scratch_shapes=[pltpu.VMEM((Bp, Hp), jnp.float32)],   # carried hidden
        ),
        compiler_params=pltpu.CompilerParams(
            dimension_semantics=("arbitrary",),   # loop-carried dependence on h
        ),
    )(x_proj, wh_t)

    # (3) fc (no bias) hoisted out of the serial loop: one parallel matmul.
    out_p = _project(rnn_out_p.reshape(Sp * Bp, Hp), wo_t).reshape(Sp, Bp, Op)

    return out_p[:S, :B, :O], rnn_out_p[:S, :B, :H]


def rnn_net_reference(x, w_i2h, w_h2h, w_fc):
    """Pure-JAX reference matching the PyTorch forward."""
    B = x.shape[1]
    H = w_i2h.shape[0]

    def step(h, x_t):
        h_new = jnp.tanh(x_t @ w_i2h.T + h @ w_h2h.T)
        return h_new, h_new

    h0 = jnp.zeros((B, H), jnp.float32)
    _, rnn_out = jax.lax.scan(step, h0, x)
    out = rnn_out @ w_fc.T
    return out, rnn_out


if __name__ == "__main__":
    # Small shapes consistent with (Seq Len, Batch, Input size).
    S, B, I, H, O = 8, 4, 8, 32, 4

    key = jax.random.PRNGKey(0)
    k_x, k_wi, k_wh, k_wo = jax.random.split(key, 4)

    x = jax.random.normal(k_x, (S, B, I), dtype=jnp.float32)
    # Deterministic parameter init mimicking nn.Linear uniform(-1/sqrt(fan_in), ...)
    w_i2h = jax.random.uniform(k_wi, (H, I), jnp.float32, -1.0, 1.0) / jnp.sqrt(I)
    w_h2h = jax.random.uniform(k_wh, (H, H), jnp.float32, -1.0, 1.0) / jnp.sqrt(H)
    w_fc = jax.random.uniform(k_wo, (O, H), jnp.float32, -1.0, 1.0) / jnp.sqrt(H)

    out_ref, rnn_ref = rnn_net_reference(x, w_i2h, w_h2h, w_fc)

    # Full-f32 path (matches the PyTorch module's numerics).
    out, rnn_out = rnn_net_forward(x, w_i2h, w_h2h, w_fc,
                                   matmul_dtype=jnp.float32)
    out = jax.block_until_ready(out)
    rnn_out = jax.block_until_ready(rnn_out)
    assert out.shape == (S, B, O) and rnn_out.shape == (S, B, H)
    assert jnp.allclose(out, out_ref, atol=1e-4, rtol=1e-4)
    assert jnp.allclose(rnn_out, rnn_ref, atol=1e-4, rtol=1e-4)

    # bf16 MXU-operand path (perf variant for v6e/v7x); f32 accumulate + f32 tanh.
    out_bf, rnn_bf = rnn_net_forward(x, w_i2h, w_h2h, w_fc,
                                     matmul_dtype=jnp.bfloat16)
    out_bf = jax.block_until_ready(out_bf)
    rnn_bf = jax.block_until_ready(rnn_bf)
    assert jnp.all(jnp.isfinite(out_bf)) and jnp.all(jnp.isfinite(rnn_bf))
    assert jnp.allclose(out_bf, out_ref, atol=3e-1, rtol=3e-1)
    assert jnp.allclose(rnn_bf, rnn_ref, atol=3e-1, rtol=3e-1)

    print("KERNEL_OK")
</pallas_src>

<mosaic_0001>
module attributes {stable_mosaic.version = 11 : i64} {
  func.func @_projection_kernel(%arg0: i32, %arg1: memref<64x8xf32, #tpu.memory_space<vmem>>, %arg2: memref<8x128xf32, #tpu.memory_space<vmem>>, %arg3: memref<64x128xf32, #tpu.memory_space<vmem>>) attributes {dimension_semantics = [#tpu.dimension_semantics<parallel>], iteration_bounds = array<i64: 1>, scalar_prefetch = 0 : i64, scratch_operands = 0 : i64, tpu.core_type = #tpu.core_type<tc>, window_params = [{transform_indices = @transform_0, window_bounds = array<i64: 64, 8>}, {pipeline_mode = #tpu.pipeline_mode<synchronous>, transform_indices = @transform_1, window_bounds = array<i64: 8, 128>}, {transform_indices = @transform_2, window_bounds = array<i64: 64, 128>}]} {
    %c0 = arith.constant 0 : index
    %c0_0 = arith.constant 0 : index
    %0 = vector.load %arg1[%c0, %c0_0] : memref<64x8xf32, #tpu.memory_space<vmem>>, vector<64x8xf32>
    %c0_1 = arith.constant 0 : index
    %c0_2 = arith.constant 0 : index
    %1 = vector.load %arg2[%c0_1, %c0_2] : memref<8x128xf32, #tpu.memory_space<vmem>>, vector<8x128xf32>
    %cst = arith.constant dense<0.000000e+00> : vector<64x128xf32>
    %2 = tpu.matmul %0, %1, %cst {dimension_numbers = #tpu.dot_dimension_numbers<[1], [0], [0], [1], [0, 0, 1, 1], [], []>} : vector<64x8xf32>, vector<8x128xf32>, vector<64x128xf32> -> vector<64x128xf32>
    %c0_3 = arith.constant 0 : index
    %c0_4 = arith.constant 0 : index
    %3 = vector.load %arg3[%c0_3, %c0_4] : memref<64x128xf32, #tpu.memory_space<vmem>>, vector<64x128xf32>
    tpu.vector_store %arg3[%c0_3, %c0_4], %2 {strides = array<i32>} : memref<64x128xf32, #tpu.memory_space<vmem>>, vector<64x128xf32>,
    return
  }
  func.func @transform_0(%arg0: i32) -> (i32, i32) {
    %c0_i32 = arith.constant 0 : i32
    %c0_i32_0 = arith.constant 0 : i32
    return %arg0, %c0_i32 : i32, i32
  }
  func.func @transform_1(%arg0: i32) -> (i32, i32) {
    %c0_i32 = arith.constant 0 : i32
    %c0_i32_0 = arith.constant 0 : i32
    %c0_i32_1 = arith.constant 0 : i32
    return %c0_i32, %c0_i32_0 : i32, i32
  }
  func.func @transform_2(%arg0: i32) -> (i32, i32) {
    %c0_i32 = arith.constant 0 : i32
    %c0_i32_0 = arith.constant 0 : i32
    return %arg0, %c0_i32 : i32, i32
  }
}

module attributes {stable_mosaic.version = 11 : i64} {
  func.func @_recurrence_kernel(%arg0: i32, %arg1: memref<8x8x128xf32, #tpu.memory_space<vmem>>, %arg2: memref<128x128xf32, #tpu.memory_space<vmem>>, %arg3: memref<8x8x128xf32, #tpu.memory_space<vmem>>, %arg4: memref<8x128xf32, #tpu.memory_space<vmem>>) attributes {dimension_semantics = [#tpu.dimension_semantics<arbitrary>], iteration_bounds = array<i64: 1>, scalar_prefetch = 0 : i64, scratch_operands = 1 : i64, tpu.core_type = #tpu.core_type<tc>, window_params = [{transform_indices = @transform_0, window_bounds = array<i64: 8, 8, 128>}, {pipeline_mode = #tpu.pipeline_mode<synchronous>, transform_indices = @transform_1, window_bounds = array<i64: 128, 128>}, {transform_indices = @transform_2, window_bounds = array<i64: 8, 8, 128>}]} {
    %c0_i32 = arith.constant 0 : i32
    %0 = arith.cmpi eq, %arg0, %c0_i32 : i32
    %1 = arith.extui %0 : i1 to i32
    %c0_i32_0 = arith.constant 0 : i32
    %2 = arith.cmpi ne, %1, %c0_i32_0 : i32
    scf.if %2 {
      %cst_46 = arith.constant 0.000000e+00 : f32
      %86 = vector.broadcast %cst_46 : f32 to vector<8x128xf32>
      %c0_47 = arith.constant 0 : index
      %c0_48 = arith.constant 0 : index
      %87 = vector.load %arg4[%c0_47, %c0_48] : memref<8x128xf32, #tpu.memory_space<vmem>>, vector<8x128xf32>
      tpu.vector_store %arg4[%c0_47, %c0_48], %86 {strides = array<i32>} : memref<8x128xf32, #tpu.memory_space<vmem>>, vector<8x128xf32>,
    } else {
    }
    %c0 = arith.constant 0 : index
    %c0_1 = arith.constant 0 : index
    %3 = vector.load %arg2[%c0, %c0_1] : memref<128x128xf32, #tpu.memory_space<vmem>>, vector<128x128xf32>
    %c0_2 = arith.constant 0 : index
    %c0_3 = arith.constant 0 : index
    %4 = vector.load %arg4[%c0_2, %c0_3] : memref<8x128xf32, #tpu.memory_space<vmem>>, vector<8x128xf32>
    %c0_i32_4 = arith.constant 0 : i32
    %5 = arith.index_cast %c0_i32_4 : i32 to index
    %c0_5 = arith.constant 0 : index
    %c0_6 = arith.constant 0 : index
    %6 = vector.load %arg1[%5, %c0_5, %c0_6] : memref<8x8x128xf32, #tpu.memory_space<vmem>>, vector<1x8x128xf32>
    %7 = vector.shape_cast %6 : vector<1x8x128xf32> to vector<8x128xf32>
    %cst = arith.constant dense<0.000000e+00> : vector<8x128xf32>
    %8 = tpu.matmul %4, %3, %cst {dimension_numbers = #tpu.dot_dimension_numbers<[1], [0], [0], [1], [0, 0, 1, 1], [], []>} : vector<8x128xf32>, vector<128x128xf32>, vector<8x128xf32> -> vector<8x128xf32>
    %9 = arith.addf %7, %8 : vector<8x128xf32>
    %10 = math.tanh %9 : vector<8x128xf32>
    %11 = arith.index_cast %c0_i32_4 : i32 to index
    %c0_7 = arith.constant 0 : index
    %c0_8 = arith.constant 0 : index
    %12 = vector.load %arg3[%11, %c0_7, %c0_8] : memref<8x8x128xf32, #tpu.memory_space<vmem>>, vector<1x8x128xf32>
    %13 = vector.shape_cast %12 : vector<1x8x128xf32> to vector<8x128xf32>
    %14 = vector.shape_cast %10 : vector<8x128xf32> to vector<1x8x128xf32>
    tpu.vector_store %arg3[%11, %c0_7, %c0_8], %14 {strides = array<i32>} : memref<8x8x128xf32, #tpu.memory_space<vmem>>, vector<1x8x128xf32>,
    %c1_i32 = arith.constant 1 : i32
    %15 = arith.index_cast %c1_i32 : i32 to index
    %c0_9 = arith.constant 0 : index
    %c0_10 = arith.constant 0 : index
    %16 = vector.load %arg1[%15, %c0_9, %c0_10] : memref<8x8x128xf32, #tpu.memory_space<vmem>>, vector<1x8x128xf32>
    %17 = vector.shape_cast %16 : vector<1x8x128xf32> to vector<8x128xf32>
    %cst_11 = arith.constant dense<0.000000e+00> : vector<8x128xf32>
    %18 = tpu.matmul %10, %3, %cst_11 {dimension_numbers = #tpu.dot_dimension_numbers<[1], [0], [0], [1], [0, 0, 1, 1], [], []>} : vector<8x128xf32>, vector<128x128xf32>, vector<8x128xf32> -> vector<8x128xf32>
    %19 = arith.addf %17, %18 : vector<8x128xf32>
    %20 = math.tanh %19 : vector<8x128xf32>
    %21 = arith.index_cast %c1_i32 : i32 to index
    %c0_12 = arith.constant 0 : index
    %c0_13 = arith.constant 0 : index
    %22 = vector.load %arg3[%21, %c0_12, %c0_13] : memref<8x8x128xf32, #tpu.memory_space<vmem>>, vector<1x8x128xf32>
    %23 = vector.shape_cast %22 : vector<1x8x128xf32> to vector<8x128xf32>
    %24 = vector.shape_cast %20 : vector<8x128xf32> to vector<1x8x128xf32>
    tpu.vector_store %arg3[%21, %c0_12, %c0_13], %24 {strides = array<i32>} : memref<8x8x128xf32, #tpu.memory_space<vmem>>, vector<1x8x128xf32>,
    %c2_i32 = arith.constant 2 : i32
    %25 = arith.index_cast %c2_i32 : i32 to index
    %c0_14 = arith.constant 0 : index
    %c0_15 = arith.constant 0 : index
    %26 = vector.load %arg1[%25, %c0_14, %c0_15] : memref<8x8x128xf32, #tpu.memory_space<vmem>>, vector<1x8x128xf32>
    %27 = vector.shape_cast %26 : vector<1x8x128xf32> to vector<8x128xf32>
    %cst_16 = arith.constant dense<0.000000e+00> : vector<8x128xf32>
    %28 = tpu.matmul %20, %3, %cst_16 {dimension_numbers = #tpu.dot_dimension_numbers<[1], [0], [0], [1], [0, 0, 1, 1], [], []>} : vector<8x128xf32>, vector<128x128xf32>, vector<8x128xf32> -> vector<8x128xf32>
    %29 = arith.addf %27, %28 : vector<8x128xf32>
    %30 = math.tanh %29 : vector<8x128xf32>
    %31 = arith.index_cast %c2_i32 : i32 to index
    %c0_17 = arith.constant 0 : index
    %c0_18 = arith.constant 0 : index
    %32 = vector.load %arg3[%31, %c0_17, %c0_18] : memref<8x8x128xf32, #tpu.memory_space<vmem>>, vector<1x8x128xf32>
    %33 = vector.shape_cast %32 : vector<1x8x128xf32> to vector<8x128xf32>
    %34 = vector.shape_cast %30 : vector<8x128xf32> to vector<1x8x128xf32>
    tpu.vector_store %arg3[%31, %c0_17, %c0_18], %34 {strides = array<i32>} : memref<8x8x128xf32, #tpu.memory_space<vmem>>, vector<1x8x128xf32>,
    %c3_i32 = arith.constant 3 : i32
    %35 = arith.index_cast %c3_i32 : i32 to index
    %c0_19 = arith.constant 0 : index
    %c0_20 = arith.constant 0 : index
    %36 = vector.load %arg1[%35, %c0_19, %c0_20] : memref<8x8x128xf32, #tpu.memory_space<vmem>>, vector<1x8x128xf32>
    %37 = vector.shape_cast %36 : vector<1x8x128xf32> to vector<8x128xf32>
    %cst_21 = arith.constant dense<0.000000e+00> : vector<8x128xf32>
    %38 = tpu.matmul %30, %3, %cst_21 {dimension_numbers = #tpu.dot_dimension_numbers<[1], [0], [0], [1], [0, 0, 1, 1], [], []>} : vector<8x128xf32>, vector<128x128xf32>, vector<8x128xf32> -> vector<8x128xf32>
    %39 = arith.addf %37, %38 : vector<8x128xf32>
    %40 = math.tanh %39 : vector<8x128xf32>
    %41 = arith.index_cast %c3_i32 : i32 to index
    %c0_22 = arith.constant 0 : index
    %c0_23 = arith.constant 0 : index
    %42 = vector.load %arg3[%41, %c0_22, %c0_23] : memref<8x8x128xf32, #tpu.memory_space<vmem>>, vector<1x8x128xf32>
    %43 = vector.shape_cast %42 : vector<1x8x128xf32> to vector<8x128xf32>
    %44 = vector.shape_cast %40 : vector<8x128xf32> to vector<1x8x128xf32>
    tpu.vector_store %arg3[%41, %c0_22, %c0_23], %44 {strides = array<i32>} : memref<8x8x128xf32, #tpu.memory_space<vmem>>, vector<1x8x128xf32>,
    %c4_i32 = arith.constant 4 : i32
    %45 = arith.index_cast %c4_i32 : i32 to index
    %c0_24 = arith.constant 0 : index
    %c0_25 = arith.constant 0 : index
    %46 = vector.load %arg1[%45, %c0_24, %c0_25] : memref<8x8x128xf32, #tpu.memory_space<vmem>>, vector<1x8x128xf32>
    %47 = vector.shape_cast %46 : vector<1x8x128xf32> to vector<8x128xf32>
    %cst_26 = arith.constant dense<0.000000e+00> : vector<8x128xf32>
    %48 = tpu.matmul %40, %3, %cst_26 {dimension_numbers = #tpu.dot_dimension_numbers<[1], [0], [0], [1], [0, 0, 1, 1], [], []>} : vector<8x128xf32>, vector<128x128xf32>, vector<8x128xf32> -> vector<8x128xf32>
    %49 = arith.addf %47, %48 : vector<8x128xf32>
    %50 = math.tanh %49 : vector<8x128xf32>
    %51 = arith.index_cast %c4_i32 : i32 to index
    %c0_27 = arith.constant 0 : index
    %c0_28 = arith.constant 0 : index
    %52 = vector.load %arg3[%51, %c0_27, %c0_28] : memref<8x8x128xf32, #tpu.memory_space<vmem>>, vector<1x8x128xf32>
    %53 = vector.shape_cast %52 : vector<1x8x128xf32> to vector<8x128xf32>
    %54 = vector.shape_cast %50 : vector<8x128xf32> to vector<1x8x128xf32>
    tpu.vector_store %arg3[%51, %c0_27, %c0_28], %54 {strides = array<i32>} : memref<8x8x128xf32, #tpu.memory_space<vmem>>, vector<1x8x128xf32>,
    %c5_i32 = arith.constant 5 : i32
    %55 = arith.index_cast %c5_i32 : i32 to index
    %c0_29 = arith.constant 0 : index
    %c0_30 = arith.constant 0 : index
    %56 = vector.load %arg1[%55, %c0_29, %c0_30] : memref<8x8x128xf32, #tpu.memory_space<vmem>>, vector<1x8x128xf32>
    %57 = vector.shape_cast %56 : vector<1x8x128xf32> to vector<8x128xf32>
    %cst_31 = arith.constant dense<0.000000e+00> : vector<8x128xf32>
    %58 = tpu.matmul %50, %3, %cst_31 {dimension_numbers = #tpu.dot_dimension_numbers<[1], [0], [0], [1], [0, 0, 1, 1], [], []>} : vector<8x128xf32>, vector<128x128xf32>, vector<8x128xf32> -> vector<8x128xf32>
    %59 = arith.addf %57, %58 : vector<8x128xf32>
    %60 = math.tanh %59 : vector<8x128xf32>
    %61 = arith.index_cast %c5_i32 : i32 to index
    %c0_32 = arith.constant 0 : index
    %c0_33 = arith.constant 0 : index
    %62 = vector.load %arg3[%61, %c0_32, %c0_33] : memref<8x8x128xf32, #tpu.memory_space<vmem>>, vector<1x8x128xf32>
    %63 = vector.shape_cast %62 : vector<1x8x128xf32> to vector<8x128xf32>
    %64 = vector.shape_cast %60 : vector<8x128xf32> to vector<1x8x128xf32>
    tpu.vector_store %arg3[%61, %c0_32, %c0_33], %64 {strides = array<i32>} : memref<8x8x128xf32, #tpu.memory_space<vmem>>, vector<1x8x128xf32>,
    %c6_i32 = arith.constant 6 : i32
    %65 = arith.index_cast %c6_i32 : i32 to index
    %c0_34 = arith.constant 0 : index
    %c0_35 = arith.constant 0 : index
    %66 = vector.load %arg1[%65, %c0_34, %c0_35] : memref<8x8x128xf32, #tpu.memory_space<vmem>>, vector<1x8x128xf32>
    %67 = vector.shape_cast %66 : vector<1x8x128xf32> to vector<8x128xf32>
    %cst_36 = arith.constant dense<0.000000e+00> : vector<8x128xf32>
    %68 = tpu.matmul %60, %3, %cst_36 {dimension_numbers = #tpu.dot_dimension_numbers<[1], [0], [0], [1], [0, 0, 1, 1], [], []>} : vector<8x128xf32>, vector<128x128xf32>, vector<8x128xf32> -> vector<8x128xf32>
    %69 = arith.addf %67, %68 : vector<8x128xf32>
    %70 = math.tanh %69 : vector<8x128xf32>
    %71 = arith.index_cast %c6_i32 : i32 to index
    %c0_37 = arith.constant 0 : index
    %c0_38 = arith.constant 0 : index
    %72 = vector.load %arg3[%71, %c0_37, %c0_38] : memref<8x8x128xf32, #tpu.memory_space<vmem>>, vector<1x8x128xf32>
    %73 = vector.shape_cast %72 : vector<1x8x128xf32> to vector<8x128xf32>
    %74 = vector.shape_cast %70 : vector<8x128xf32> to vector<1x8x128xf32>
    tpu.vector_store %arg3[%71, %c0_37, %c0_38], %74 {strides = array<i32>} : memref<8x8x128xf32, #tpu.memory_space<vmem>>, vector<1x8x128xf32>,
    %c7_i32 = arith.constant 7 : i32
    %75 = arith.index_cast %c7_i32 : i32 to index
    %c0_39 = arith.constant 0 : index
    %c0_40 = arith.constant 0 : index
    %76 = vector.load %arg1[%75, %c0_39, %c0_40] : memref<8x8x128xf32, #tpu.memory_space<vmem>>, vector<1x8x128xf32>
    %77 = vector.shape_cast %76 : vector<1x8x128xf32> to vector<8x128xf32>
    %cst_41 = arith.constant dense<0.000000e+00> : vector<8x128xf32>
    %78 = tpu.matmul %70, %3, %cst_41 {dimension_numbers = #tpu.dot_dimension_numbers<[1], [0], [0], [1], [0, 0, 1, 1], [], []>} : vector<8x128xf32>, vector<128x128xf32>, vector<8x128xf32> -> vector<8x128xf32>
    %79 = arith.addf %77, %78 : vector<8x128xf32>
    %80 = math.tanh %79 : vector<8x128xf32>
    %81 = arith.index_cast %c7_i32 : i32 to index
    %c0_42 = arith.constant 0 : index
    %c0_43 = arith.constant 0 : index
    %82 = vector.load %arg3[%81, %c0_42, %c0_43] : memref<8x8x128xf32, #tpu.memory_space<vmem>>, vector<1x8x128xf32>
    %83 = vector.shape_cast %82 : vector<1x8x128xf32> to vector<8x128xf32>
    %84 = vector.shape_cast %80 : vector<8x128xf32> to vector<1x8x128xf32>
    tpu.vector_store %arg3[%81, %c0_42, %c0_43], %84 {strides = array<i32>} : memref<8x8x128xf32, #tpu.memory_space<vmem>>, vector<1x8x128xf32>,
    %c8_i32 = arith.constant 8 : i32
    %c0_44 = arith.constant 0 : index
    %c0_45 = arith.constant 0 : index
    %85 = vector.load %arg4[%c0_44, %c0_45] : memref<8x128xf32, #tpu.memory_space<vmem>>, vector<8x128xf32>
    tpu.vector_store %arg4[%c0_44, %c0_45], %80 {strides = array<i32>} : memref<8x128xf32, #tpu.memory_space<vmem>>, vector<8x128xf32>,
    return
  }
  func.func @transform_0(%arg0: i32) -> (i32, i32, i32) {
    %c0_i32 = arith.constant 0 : i32
    %c0_i32_0 = arith.constant 0 : i32
    %c0_i32_1 = arith.constant 0 : i32
    return %arg0, %c0_i32, %c0_i32_0 : i32, i32, i32
  }
  func.func @transform_1(%arg0: i32) -> (i32, i32) {
    %c0_i32 = arith.constant 0 : i32
    %c0_i32_0 = arith.constant 0 : i32
    %c0_i32_1 = arith.constant 0 : i32
    return %c0_i32, %c0_i32_0 : i32, i32
  }
  func.func @transform_2(%arg0: i32) -> (i32, i32, i32) {
    %c0_i32 = arith.constant 0 : i32
    %c0_i32_0 = arith.constant 0 : i32
    %c0_i32_1 = arith.constant 0 : i32
    return %arg0, %c0_i32, %c0_i32_0 : i32, i32, i32
  }
}

module attributes {stable_mosaic.version = 11 : i64} {
  func.func @_projection_kernel(%arg0: i32, %arg1: memref<64x128xf32, #tpu.memory_space<vmem>>, %arg2: memref<128x128xf32, #tpu.memory_space<vmem>>, %arg3: memref<64x128xf32, #tpu.memory_space<vmem>>) attributes {dimension_semantics = [#tpu.dimension_semantics<parallel>], iteration_bounds = array<i64: 1>, scalar_prefetch = 0 : i64, scratch_operands = 0 : i64, tpu.core_type = #tpu.core_type<tc>, window_params = [{transform_indices = @transform_0, window_bounds = array<i64: 64, 128>}, {pipeline_mode = #tpu.pipeline_mode<synchronous>, transform_indices = @transform_1, window_bounds = array<i64: 128, 128>}, {transform_indices = @transform_2, window_bounds = array<i64: 64, 128>}]} {
    %c0 = arith.constant 0 : index
    %c0_0 = arith.constant 0 : index
    %0 = vector.load %arg1[%c0, %c0_0] : memref<64x128xf32, #tpu.memory_space<vmem>>, vector<64x128xf32>
    %c0_1 = arith.constant 0 : index
    %c0_2 = arith.constant 0 : index
    %1 = vector.load %arg2[%c0_1, %c0_2] : memref<128x128xf32, #tpu.memory_space<vmem>>, vector<128x128xf32>
    %cst = arith.constant dense<0.000000e+00> : vector<64x128xf32>
    %2 = tpu.matmul %0, %1, %cst {dimension_numbers = #tpu.dot_dimension_numbers<[1], [0], [0], [1], [0, 0, 1, 1], [], []>} : vector<64x128xf32>, vector<128x128xf32>, vector<64x128xf32> -> vector<64x128xf32>
    %c0_3 = arith.constant 0 : index
    %c0_4 = arith.constant 0 : index
    %3 = vector.load %arg3[%c0_3, %c0_4] : memref<64x128xf32, #tpu.memory_space<vmem>>, vector<64x128xf32>
    tpu.vector_store %arg3[%c0_3, %c0_4], %2 {strides = array<i32>} : memref<64x128xf32, #tpu.memory_space<vmem>>, vector<64x128xf32>,
    return
  }
  func.func @transform_0(%arg0: i32) -> (i32, i32) {
    %c0_i32 = arith.constant 0 : i32
    %c0_i32_0 = arith.constant 0 : i32
    return %arg0, %c0_i32 : i32, i32
  }
  func.func @transform_1(%arg0: i32) -> (i32, i32) {
    %c0_i32 = arith.constant 0 : i32
    %c0_i32_0 = arith.constant 0 : i32
    %c0_i32_1 = arith.constant 0 : i32
    return %c0_i32, %c0_i32_0 : i32, i32
  }
  func.func @transform_2(%arg0: i32) -> (i32, i32) {
    %c0_i32 = arith.constant 0 : i32
    %c0_i32_0 = arith.constant 0 : i32
    return %arg0, %c0_i32 : i32, i32
  }
}

</mosaic_0001>

<bundles_post_ra>
// kernel: rnn_net_forward.3
= control target key start
LH: loop header
LB: loop body
LE: loop exit
PB: predicated region body
PF: predicated region fallthrough
CT: control target
= control target key end

     0   :  { %vm20_vm0 = vcmask 64512   ;;  %s183_s1 = inlined_call_operand.vmem [shape: f32[8,128], index: 1, kind: input, shape index: {}]   ;;  %s184_s0 = inlined_call_operand.vmem [shape: f32[64,8], index: 0, kind: input, shape index: {}]   ;;  %s185_s2 = inlined_call_operand.vmem [shape: f32[64,128], index: 2, kind: output, shape index: {}]  }
   0x1   :  { %v19_v0 = vld [vmem:[%s183_s1] sm:$0xff]  ;;  %v17_v2 = vld [vmem:[%s184_s0 + $0x30] sm:$0xff]  ;;  %v16_v5 = vld [vmem:[%s184_s0 + $0x28] sm:$0xff] }
   0x2   :  { %v15_v1 = vld [vmem:[%s184_s0 + $0x20] sm:$0xff]  ;;  %107 = vmatpush.msra.mxu2 %v19_v0  ;;  %108 = vmatpush.msra.mxu3 %v19_v0  ;;  %v13_v4 = vld [vmem:[%s184_s0 + $0x10] sm:$0xff]  ;;  %v18_v6 = vld [vmem:[%s184_s0 + $0x38] sm:$0xff] }
   0x3   :  { %v11_v3 = vld [vmem:[%s184_s0] sm:$0xff]  ;;  %102 = vmatmul.msk.f32.vlgmr.msra.gmra.mxu2 %vm20_vm0, %v15_v1  ;;  %104 = vmatmul.msk.f32.vlgmr.msra.gmra.mxu3 %vm20_vm0, %v17_v2  ;;  %v12_v7 = vld [vmem:[%s184_s0 + $0x8] sm:$0xff]  ;;  %v14_v8 = vld [vmem:[%s184_s0 + $0x18] sm:$0xff] }
   0x4   :  { %60 = vmatpush.msra.mxu0 %v19_v0  ;;  %106 = vmatpush.msra.mxu1 %v19_v0 }
   0x5   :  { %98 = vmatmul.msk.f32.vlgmr.msra.gmra.mxu0 %vm20_vm0, %v11_v3  ;;  %100 = vmatmul.msk.f32.vlgmr.msra.gmra.mxu1 %vm20_vm0, %v13_v4 }
   0xb   :  { %103 = vmatmul.msk.f32.gmra.mxu2 %vm20_vm0, %v16_v5  ;;  %105 = vmatmul.msk.f32.gmra.mxu3 %vm20_vm0, %v18_v6 }
   0xd   :  { %99 = vmatmul.msk.f32.gmra.mxu0 %vm20_vm0, %v12_v7  ;;  %101 = vmatmul.msk.f32.gmra.mxu1 %vm20_vm0, %v14_v8 }
  0x82   :  { %v62_v9 = vpop.f32.mrf.mxu0  ;;  %v68_v10 = vpop.f32.mrf.mxu1 }
  0x83   :  { %86 = vst [vmem:[%s185_s2] sm:$0xff] %v62_v9 }
  0x84   :  { %88 = vst [vmem:[%s185_s2 + $0x10] sm:$0xff] %v68_v10 }
  0x86   :  { %v74_v11 = vpop.f32.mrf.mxu2  ;;  %v80_v12 = vpop.f32.mrf.mxu3 }
  0x87   :  { %90 = vst [vmem:[%s185_s2 + $0x20] sm:$0xff] %v74_v11 }
  0x88   :  { %92 = vst [vmem:[%s185_s2 + $0x30] sm:$0xff] %v80_v12 }
  0x8a   :  { %v65_v13 = vpop.f32.mrf.mxu0  ;;  %v71_v14 = vpop.f32.mrf.mxu1 }
  0x8b   :  { %87 = vst [vmem:[%s185_s2 + $0x8] sm:$0xff] %v65_v13 }
  0x8c   :  { %89 = vst [vmem:[%s185_s2 + $0x18] sm:$0xff] %v71_v14 }
  0x8e   :  { %v77_v15 = vpop.f32.mrf.mxu2  ;;  %v83_v16 = vpop.f32.mrf.mxu3 }
  0x8f   :  { %91 = vst [vmem:[%s185_s2 + $0x28] sm:$0xff] %v77_v15 }
  0x90   :  { %93 = vst [vmem:[%s185_s2 + $0x38] sm:$0xff] %v83_v16 }

// kernel: rnn_net_forward.5
= control target key start
LH: loop header
LB: loop body
LE: loop exit
PB: predicated region body
PF: predicated region fallthrough
CT: control target
= control target key end

     0   :  { %s247_s1 = inlined_call_operand.vmem [shape: f32[128,128], index: 1, kind: input, shape index: {}]   ;;  %s248_s0 = inlined_call_operand.vmem [shape: f32[64,128], index: 0, kind: input, shape index: {}]   ;;  %s249_s2 = inlined_call_operand.vmem [shape: f32[64,128], index: 2, kind: output, shape index: {}]  }
   0x1   :  { %v34_v0 = vld [vmem:[%s247_s1 + $0x78] sm:$0xff]  ;;  %v33_v1 = vld [vmem:[%s247_s1 + $0x70] sm:$0xff]  ;;  %v32_v2 = vld [vmem:[%s247_s1 + $0x68] sm:$0xff] }
   0x2   :  { %89 = vmatpush.msra.mxu2 %v34_v0  ;;  %90 = vmatpush.msra.mxu3 %v34_v0  ;;  %v31_v3 = vld [vmem:[%s247_s1 + $0x60] sm:$0xff]  ;;  %v30_v4 = vld [vmem:[%s247_s1 + $0x58] sm:$0xff]  ;;  %v29_v5 = vld [vmem:[%s247_s1 + $0x50] sm:$0xff] }
   0x3   :  { %35 = vmatpush.msra.mxu0 %v34_v0  ;;  %88 = vmatpush.msra.mxu1 %v34_v0  ;;  %v28_v6 = vld [vmem:[%s247_s1 + $0x48] sm:$0xff]  ;;  %v27_v7 = vld [vmem:[%s247_s1 + $0x40] sm:$0xff]  ;;  %v26_v8 = vld [vmem:[%s247_s1 + $0x38] sm:$0xff] }
   0x4   :  { %92 = vmatpush.msra.mxu2 %v33_v1  ;;  %93 = vmatpush.msra.mxu3 %v33_v1  ;;  %v25_v9 = vld [vmem:[%s247_s1 + $0x30] sm:$0xff]  ;;  %v24_v10 = vld [vmem:[%s247_s1 + $0x28] sm:$0xff]  ;;  %v23_v11 = vld [vmem:[%s247_s1 + $0x20] sm:$0xff] }
   0x5   :  { %36 = vmatpush.msra.mxu0 %v33_v1  ;;  %91 = vmatpush.msra.mxu1 %v33_v1  ;;  %v22_v12 = vld [vmem:[%s247_s1 + $0x18] sm:$0xff]  ;;  %v21_v13 = vld [vmem:[%s247_s1 + $0x10] sm:$0xff]  ;;  %v20_v14 = vld [vmem:[%s247_s1 + $0x8] sm:$0xff] }
   0x6   :  { %95 = vmatpush.msra.mxu2 %v32_v2  ;;  %96 = vmatpush.msra.mxu3 %v32_v2  ;;  %v19_v15 = vld [vmem:[%s247_s1] sm:$0xff]  ;;  %v17_v17 = vld [vmem:[%s248_s0 + $0x30] sm:$0xff]  ;;  %v16_v20 = vld [vmem:[%s248_s0 + $0x28] sm:$0xff] }
   0x7   :  { %37 = vmatpush.msra.mxu0 %v32_v2  ;;  %94 = vmatpush.msra.mxu1 %v32_v2  ;;  %v15_v16 = vld [vmem:[%s248_s0 + $0x20] sm:$0xff]  ;;  %v13_v19 = vld [vmem:[%s248_s0 + $0x10] sm:$0xff]  ;;  %v18_v21 = vld [vmem:[%s248_s0 + $0x38] sm:$0xff] }
   0x8   :  { %98 = vmatpush.msra.mxu2 %v31_v3  ;;  %99 = vmatpush.msra.mxu3 %v31_v3  ;;  %v11_v18 = vld [vmem:[%s248_s0] sm:$0xff]  ;;  %v12_v22 = vld [vmem:[%s248_s0 + $0x8] sm:$0xff]  ;;  %v14_v23 = vld [vmem:[%s248_s0 + $0x18] sm:$0xff] }
   0x9   :  { %38 = vmatpush.msra.mxu0 %v31_v3  ;;  %97 = vmatpush.msra.mxu1 %v31_v3 }
   0xa   :  { %101 = vmatpush.msra.mxu2 %v30_v4  ;;  %102 = vmatpush.msra.mxu3 %v30_v4 }
   0xb   :  { %39 = vmatpush.msra.mxu0 %v30_v4  ;;  %100 = vmatpush.msra.mxu1 %v30_v4 }
   0xc   :  { %104 = vmatpush.msra.mxu2 %v29_v5  ;;  %105 = vmatpush.msra.mxu3 %v29_v5 }
   0xd   :  { %40 = vmatpush.msra.mxu0 %v29_v5  ;;  %103 = vmatpush.msra.mxu1 %v29_v5 }
   0xe   :  { %107 = vmatpush.msra.mxu2 %v28_v6  ;;  %108 = vmatpush.msra.mxu3 %v28_v6 }
   0xf   :  { %41 = vmatpush.msra.mxu0 %v28_v6  ;;  %106 = vmatpush.msra.mxu1 %v28_v6 }
  0x10   :  { %110 = vmatpush.msra.mxu2 %v27_v7  ;;  %111 = vmatpush.msra.mxu3 %v27_v7 }
  0x11   :  { %42 = vmatpush.msra.mxu0 %v27_v7  ;;  %109 = vmatpush.msra.mxu1 %v27_v7 }
  0x12   :  { %113 = vmatpush.msra.mxu2 %v26_v8  ;;  %114 = vmatpush.msra.mxu3 %v26_v8 }
  0x13   :  { %43 = vmatpush.msra.mxu0 %v26_v8  ;;  %112 = vmatpush.msra.mxu1 %v26_v8 }
  0x14   :  { %116 = vmatpush.msra.mxu2 %v25_v9  ;;  %117 = vmatpush.msra.mxu3 %v25_v9 }
  0x15   :  { %44 = vmatpush.msra.mxu0 %v25_v9  ;;  %115 = vmatpush.msra.mxu1 %v25_v9 }
  0x16   :  { %119 = vmatpush.msra.mxu2 %v24_v10  ;;  %120 = vmatpush.msra.mxu3 %v24_v10 }
  0x17   :  { %45 = vmatpush.msra.mxu0 %v24_v10  ;;  %118 = vmatpush.msra.mxu1 %v24_v10 }
  0x18   :  { %122 = vmatpush.msra.mxu2 %v23_v11  ;;  %123 = vmatpush.msra.mxu3 %v23_v11 }
  0x19   :  { %46 = vmatpush.msra.mxu0 %v23_v11  ;;  %121 = vmatpush.msra.mxu1 %v23_v11 }
  0x1a   :  { %125 = vmatpush.msra.mxu2 %v22_v12  ;;  %126 = vmatpush.msra.mxu3 %v22_v12 }
  0x1b   :  { %47 = vmatpush.msra.mxu0 %v22_v12  ;;  %124 = vmatpush.msra.mxu1 %v22_v12 }
  0x1c   :  { %128 = vmatpush.msra.mxu2 %v21_v13  ;;  %129 = vmatpush.msra.mxu3 %v21_v13 }
  0x1d   :  { %48 = vmatpush.msra.mxu0 %v21_v13  ;;  %127 = vmatpush.msra.mxu1 %v21_v13 }
  0x1e   :  { %131 = vmatpush.msra.mxu2 %v20_v14  ;;  %132 = vmatpush.msra.mxu3 %v20_v14 }
  0x1f   :  { %49 = vmatpush.msra.mxu0 %v20_v14  ;;  %130 = vmatpush.msra.mxu1 %v20_v14 }
  0x20   :  { %134 = vmatpush.msra.mxu2 %v19_v15  ;;  %135 = vmatpush.msra.mxu3 %v19_v15 }
  0x21   :  { %63 = vmatmul.f32.vlgmr.msra.gmra.mxu2 %v15_v16  ;;  %69 = vmatmul.f32.vlgmr.msra.gmra.mxu3 %v17_v17 }
  0x22   :  { %50 = vmatpush.msra.mxu0 %v19_v15  ;;  %133 = vmatpush.msra.mxu1 %v19_v15 }
  0x23   :  { %51 = vmatmul.f32.vlgmr.msra.gmra.mxu0 %v11_v18  ;;  %57 = vmatmul.f32.vlgmr.msra.gmra.mxu1 %v13_v19 }
  0x29   :  { %66 = vmatmul.f32.gmra.mxu2 %v16_v20  ;;  %72 = vmatmul.f32.gmra.mxu3 %v18_v21 }
  0x2b   :  { %54 = vmatmul.f32.gmra.mxu0 %v12_v22  ;;  %60 = vmatmul.f32.gmra.mxu1 %v14_v23 }
  0xa0   :  { %v52_v24 = vpop.f32.mrf.mxu0  ;;  %v58_v25 = vpop.f32.mrf.mxu1 }
  0xa1   :  { %76 = vst [vmem:[%s249_s2] sm:$0xff] %v52_v24 }
  0xa2   :  { %78 = vst [vmem:[%s249_s2 + $0x10] sm:$0xff] %v58_v25 }
  0xa4   :  { %v64_v26 = vpop.f32.mrf.mxu2  ;;  %v70_v27 = vpop.f32.mrf.mxu3 }
  0xa5   :  { %80 = vst [vmem:[%s249_s2 + $0x20] sm:$0xff] %v64_v26 }
  0xa6   :  { %82 = vst [vmem:[%s249_s2 + $0x30] sm:$0xff] %v70_v27 }
  0xa8   :  { %v55_v28 = vpop.f32.mrf.mxu0  ;;  %v61_v29 = vpop.f32.mrf.mxu1 }
  0xa9   :  { %77 = vst [vmem:[%s249_s2 + $0x8] sm:$0xff] %v55_v28 }
  0xaa   :  { %79 = vst [vmem:[%s249_s2 + $0x18] sm:$0xff] %v61_v29 }
  0xac   :  { %v67_v30 = vpop.f32.mrf.mxu2  ;;  %v73_v31 = vpop.f32.mrf.mxu3 }
  0xad   :  { %81 = vst [vmem:[%s249_s2 + $0x28] sm:$0xff] %v67_v30 }
  0xae   :  { %83 = vst [vmem:[%s249_s2 + $0x38] sm:$0xff] %v73_v31 }

// kernel: rnn_net_forward.4
= control target key start
LH: loop header
LB: loop body
LE: loop exit
PB: predicated region body
PF: predicated region fallthrough
CT: control target
= control target key end

     0   :  { %v275_v16 = vmov 0.0   ;;  %s547_s1 = inlined_call_operand.vmem [shape: f32[128,128], index: 1, kind: input, shape index: {}]   ;;  %s548_s0 = inlined_call_operand.vmem [shape: f32[8,8,128], index: 0, kind: input, shape index: {}]   ;;  %s549_s2 = inlined_call_operand.vmem [shape: f32[8,8,128], index: 2, kind: output, shape index: {}]  }
   0x1   :  { %v294_v0 = vld [vmem:[%s547_s1 + $0x78] sm:$0xff]  ;;  %v299_v1 = vld [vmem:[%s547_s1 + $0x70] sm:$0xff]  ;;  %v306_v2 = vld [vmem:[%s547_s1 + $0x68] sm:$0xff] }
   0x2   :  { %34 = vmatpush.msra.mxu0 %v294_v0  ;;  %59 = vmatpush.msra.mxu1 %v294_v0  ;;  %v315_v3 = vld [vmem:[%s547_s1 + $0x60] sm:$0xff]  ;;  %v324_v4 = vld [vmem:[%s547_s1 + $0x58] sm:$0xff]  ;;  %v333_v5 = vld [vmem:[%s547_s1 + $0x50] sm:$0xff] }
   0x3   :  { %85 = vmatpush.msra.mxu2 %v294_v0  ;;  %111 = vmatpush.msra.mxu3 %v294_v0  ;;  %v342_v6 = vld [vmem:[%s547_s1 + $0x48] sm:$0xff]  ;;  %v351_v7 = vld [vmem:[%s547_s1 + $0x40] sm:$0xff]  ;;  %v360_v8 = vld [vmem:[%s547_s1 + $0x38] sm:$0xff] }
   0x4   :  { %35 = vmatpush.msra.mxu0 %v299_v1  ;;  %60 = vmatpush.msra.mxu1 %v299_v1  ;;  %v369_v9 = vld [vmem:[%s547_s1 + $0x30] sm:$0xff]  ;;  %v378_v10 = vld [vmem:[%s547_s1 + $0x28] sm:$0xff]  ;;  %v387_v11 = vld [vmem:[%s547_s1 + $0x20] sm:$0xff] }
   0x5   :  { %86 = vmatpush.msra.mxu2 %v299_v1  ;;  %112 = vmatpush.msra.mxu3 %v299_v1  ;;  %v396_v12 = vld [vmem:[%s547_s1 + $0x18] sm:$0xff]  ;;  %v405_v13 = vld [vmem:[%s547_s1 + $0x10] sm:$0xff]  ;;  %v414_v14 = vld [vmem:[%s547_s1 + $0x8] sm:$0xff] }
   0x6   :  { %36 = vmatpush.msra.mxu0 %v306_v2  ;;  %61 = vmatpush.msra.mxu1 %v306_v2  ;;  %v423_v15 = vld [vmem:[%s547_s1] sm:$0xff]  ;;  %v244_v21 = vld [vmem:[%s548_s0 + $0x8] sm:$0xff]  ;;  %v246_v25 = vld [vmem:[%s548_s0 + $0x10] sm:$0xff] }
   0x7   :  { %87 = vmatpush.msra.mxu2 %v306_v2  ;;  %113 = vmatpush.msra.mxu3 %v306_v2  ;;  %v33_v17 = vld [vmem:[%s548_s0] sm:$0xff]  ;;  %v248_v29 = vld [vmem:[%s548_s0 + $0x18] sm:$0xff]  ;;  %v252_v37 = vld [vmem:[%s548_s0 + $0x28] sm:$0xff] }
   0x8   :  { %37 = vmatpush.msra.mxu0 %v315_v3  ;;  %62 = vmatpush.msra.mxu1 %v315_v3  ;;  %v250_v33 = vld [vmem:[%s548_s0 + $0x20] sm:$0xff]  ;;  %v254_v41 = vld [vmem:[%s548_s0 + $0x30] sm:$0xff]  ;;  %v256_v45 = vld [vmem:[%s548_s0 + $0x38] sm:$0xff] }
   0x9   :  { %88 = vmatpush.msra.mxu2 %v315_v3  ;;  %114 = vmatpush.msra.mxu3 %v315_v3 }
   0xa   :  { %38 = vmatpush.msra.mxu0 %v324_v4  ;;  %63 = vmatpush.msra.mxu1 %v324_v4 }
   0xb   :  { %89 = vmatpush.msra.mxu2 %v324_v4  ;;  %115 = vmatpush.msra.mxu3 %v324_v4 }
   0xc   :  { %39 = vmatpush.msra.mxu0 %v333_v5  ;;  %64 = vmatpush.msra.mxu1 %v333_v5 }
   0xd   :  { %90 = vmatpush.msra.mxu2 %v333_v5  ;;  %116 = vmatpush.msra.mxu3 %v333_v5 }
   0xe   :  { %40 = vmatpush.msra.mxu0 %v342_v6  ;;  %65 = vmatpush.msra.mxu1 %v342_v6 }
   0xf   :  { %91 = vmatpush.msra.mxu2 %v342_v6  ;;  %117 = vmatpush.msra.mxu3 %v342_v6 }
  0x10   :  { %41 = vmatpush.msra.mxu0 %v351_v7  ;;  %66 = vmatpush.msra.mxu1 %v351_v7 }
  0x11   :  { %92 = vmatpush.msra.mxu2 %v351_v7  ;;  %118 = vmatpush.msra.mxu3 %v351_v7 }
  0x12   :  { %42 = vmatpush.msra.mxu0 %v360_v8  ;;  %67 = vmatpush.msra.mxu1 %v360_v8 }
  0x13   :  { %93 = vmatpush.msra.mxu2 %v360_v8  ;;  %119 = vmatpush.msra.mxu3 %v360_v8 }
  0x14   :  { %43 = vmatpush.msra.mxu0 %v369_v9  ;;  %68 = vmatpush.msra.mxu1 %v369_v9 }
  0x15   :  { %94 = vmatpush.msra.mxu2 %v369_v9  ;;  %120 = vmatpush.msra.mxu3 %v369_v9 }
  0x16   :  { %44 = vmatpush.msra.mxu0 %v378_v10  ;;  %69 = vmatpush.msra.mxu1 %v378_v10 }
  0x17   :  { %95 = vmatpush.msra.mxu2 %v378_v10  ;;  %121 = vmatpush.msra.mxu3 %v378_v10 }
  0x18   :  { %45 = vmatpush.msra.mxu0 %v387_v11  ;;  %70 = vmatpush.msra.mxu1 %v387_v11 }
  0x19   :  { %96 = vmatpush.msra.mxu2 %v387_v11  ;;  %122 = vmatpush.msra.mxu3 %v387_v11 }
  0x1a   :  { %46 = vmatpush.msra.mxu0 %v396_v12  ;;  %71 = vmatpush.msra.mxu1 %v396_v12 }
  0x1b   :  { %97 = vmatpush.msra.mxu2 %v396_v12  ;;  %123 = vmatpush.msra.mxu3 %v396_v12 }
  0x1c   :  { %47 = vmatpush.msra.mxu0 %v405_v13  ;;  %72 = vmatpush.msra.mxu1 %v405_v13 }
  0x1d   :  { %98 = vmatpush.msra.mxu2 %v405_v13  ;;  %124 = vmatpush.msra.mxu3 %v405_v13 }
  0x1e   :  { %48 = vmatpush.msra.mxu0 %v414_v14  ;;  %73 = vmatpush.msra.mxu1 %v414_v14 }
  0x1f   :  { %99 = vmatpush.msra.mxu2 %v414_v14  ;;  %125 = vmatpush.msra.mxu3 %v414_v14 }
  0x20   :  { %49 = vmatpush.msra.mxu0 %v423_v15  ;;  %74 = vmatpush.msra.mxu1 %v423_v15 }
  0x21   :  { %50 = vmatmul.f32.vlgmr.msra.gmra.mxu0 %v275_v16  ;;  %100 = vmatpush.msra.mxu2 %v423_v15 }
  0x22   :  { %126 = vmatpush.msra.mxu3 %v423_v15  ;;  %137 = vmatpush.msrb.mxu0 %v294_v0 }
  0x23   :  { %163 = vmatpush.msrb.mxu1 %v294_v0  ;;  %189 = vmatpush.msrb.mxu2 %v294_v0 }
  0x24   :  { %138 = vmatpush.msrb.mxu0 %v299_v1  ;;  %215 = vmatpush.msrb.mxu3 %v294_v0 }
  0x25   :  { %164 = vmatpush.msrb.mxu1 %v299_v1  ;;  %190 = vmatpush.msrb.mxu2 %v299_v1 }
  0x26   :  { %139 = vmatpush.msrb.mxu0 %v306_v2  ;;  %216 = vmatpush.msrb.mxu3 %v299_v1 }
  0x27   :  { %165 = vmatpush.msrb.mxu1 %v306_v2  ;;  %191 = vmatpush.msrb.mxu2 %v306_v2 }
  0x28   :  { %140 = vmatpush.msrb.mxu0 %v315_v3  ;;  %217 = vmatpush.msrb.mxu3 %v306_v2 }
  0x29   :  { %166 = vmatpush.msrb.mxu1 %v315_v3  ;;  %192 = vmatpush.msrb.mxu2 %v315_v3 }
  0x2a   :  { %141 = vmatpush.msrb.mxu0 %v324_v4  ;;  %218 = vmatpush.msrb.mxu3 %v315_v3 }
  0x2b   :  { %167 = vmatpush.msrb.mxu1 %v324_v4  ;;  %193 = vmatpush.msrb.mxu2 %v324_v4 }
  0x2c   :  { %142 = vmatpush.msrb.mxu0 %v333_v5  ;;  %219 = vmatpush.msrb.mxu3 %v324_v4 }
  0x2d   :  { %168 = vmatpush.msrb.mxu1 %v333_v5  ;;  %194 = vmatpush.msrb.mxu2 %v333_v5 }
  0x2e   :  { %143 = vmatpush.msrb.mxu0 %v342_v6  ;;  %220 = vmatpush.msrb.mxu3 %v333_v5 }
  0x2f   :  { %169 = vmatpush.msrb.mxu1 %v342_v6  ;;  %195 = vmatpush.msrb.mxu2 %v342_v6 }
  0x30   :  { %144 = vmatpush.msrb.mxu0 %v351_v7  ;;  %221 = vmatpush.msrb.mxu3 %v342_v6 }
  0x31   :  { %170 = vmatpush.msrb.mxu1 %v351_v7  ;;  %196 = vmatpush.msrb.mxu2 %v351_v7 }
  0x32   :  { %145 = vmatpush.msrb.mxu0 %v360_v8  ;;  %222 = vmatpush.msrb.mxu3 %v351_v7 }
  0x33   :  { %171 = vmatpush.msrb.mxu1 %v360_v8  ;;  %197 = vmatpush.msrb.mxu2 %v360_v8 }
  0x34   :  { %146 = vmatpush.msrb.mxu0 %v369_v9  ;;  %223 = vmatpush.msrb.mxu3 %v360_v8 }
  0x35   :  { %172 = vmatpush.msrb.mxu1 %v369_v9  ;;  %198 = vmatpush.msrb.mxu2 %v369_v9 }
  0x36   :  { %147 = vmatpush.msrb.mxu0 %v378_v10  ;;  %224 = vmatpush.msrb.mxu3 %v369_v9 }
  0x37   :  { %173 = vmatpush.msrb.mxu1 %v378_v10  ;;  %199 = vmatpush.msrb.mxu2 %v378_v10 }
  0x38   :  { %148 = vmatpush.msrb.mxu0 %v387_v11  ;;  %225 = vmatpush.msrb.mxu3 %v378_v10 }
  0x39   :  { %174 = vmatpush.msrb.mxu1 %v387_v11  ;;  %200 = vmatpush.msrb.mxu2 %v387_v11 }
  0x3a   :  { %149 = vmatpush.msrb.mxu0 %v396_v12  ;;  %226 = vmatpush.msrb.mxu3 %v387_v11 }
  0x3b   :  { %175 = vmatpush.msrb.mxu1 %v396_v12  ;;  %201 = vmatpush.msrb.mxu2 %v396_v12 }
  0x3c   :  { %150 = vmatpush.msrb.mxu0 %v405_v13  ;;  %227 = vmatpush.msrb.mxu3 %v396_v12 }
  0x3d   :  { %176 = vmatpush.msrb.mxu1 %v405_v13  ;;  %202 = vmatpush.msrb.mxu2 %v405_v13 }
  0x3e   :  { %151 = vmatpush.msrb.mxu0 %v414_v14  ;;  %228 = vmatpush.msrb.mxu3 %v405_v13 }
  0x3f   :  { %177 = vmatpush.msrb.mxu1 %v414_v14  ;;  %203 = vmatpush.msrb.mxu2 %v414_v14 }
  0x40   :  { %152 = vmatpush.msrb.mxu0 %v423_v15  ;;  %229 = vmatpush.msrb.mxu3 %v414_v14 }
  0x41   :  { %178 = vmatpush.msrb.mxu1 %v423_v15  ;;  %204 = vmatpush.msrb.mxu2 %v423_v15 }
  0x42   :  { %230 = vmatpush.msrb.mxu3 %v423_v15 }
  0x9e   :  { %v51_v18 = vpop.f32.mrf.mxu0 }
  0x9f   :  { %v54_v19 = vadd.f32 %v51_v18, %v33_v17 }
  0xa1   :  { %259 = vtanh.f32 %v54_v19 }
  0xa7   :  { %v260_v20 = vpop.eup %259 }
  0xa8   :  { %56 = vst [vmem:[%s549_s2] sm:$0xff] %v260_v20  ;;  %75 = vmatmul.f32.vlgmr.msra.gmra.mxu1 %v260_v20 }
 0x125   :  { %v76_v22 = vpop.f32.mrf.mxu1 }
 0x126   :  { %v79_v23 = vadd.f32 %v244_v21, %v76_v22 }
 0x128   :  { %261 = vtanh.f32 %v79_v23 }
 0x12e   :  { %v262_v24 = vpop.eup %261 }
 0x12f   :  { %245 = vst [vmem:[%s549_s2 + $0x8] sm:$0xff] %v262_v24  ;;  %101 = vmatmul.f32.vlgmr.msra.gmra.mxu2 %v262_v24 }
 0x1b2   :  { %v102_v26 = vpop.f32.mrf.mxu2 }
 0x1b3   :  { %v105_v27 = vadd.f32 %v246_v25, %v102_v26 }
 0x1b5   :  { %263 = vtanh.f32 %v105_v27 }
 0x1bb   :  { %v264_v28 = vpop.eup %263 }
 0x1bc   :  { %247 = vst [vmem:[%s549_s2 + $0x10] sm:$0xff] %v264_v28  ;;  %127 = vmatmul.f32.vlgmr.msra.gmra.mxu3 %v264_v28 }
 0x23f   :  { %v128_v30 = vpop.f32.mrf.mxu3 }
 0x240   :  { %v131_v31 = vadd.f32 %v248_v29, %v128_v30 }
 0x242   :  { %265 = vtanh.f32 %v131_v31 }
 0x248   :  { %v266_v32 = vpop.eup %265 }
 0x249   :  { %249 = vst [vmem:[%s549_s2 + $0x18] sm:$0xff] %v266_v32  ;;  %153 = vmatmul.f32.vlgmr.msrb.gmra.mxu0 %v266_v32 }
 0x2c6   :  { %v154_v34 = vpop.f32.mrf.mxu0 }
 0x2c7   :  { %v157_v35 = vadd.f32 %v250_v33, %v154_v34 }
 0x2c9   :  { %267 = vtanh.f32 %v157_v35 }
 0x2cf   :  { %v268_v36 = vpop.eup %267 }
 0x2d0   :  { %251 = vst [vmem:[%s549_s2 + $0x20] sm:$0xff] %v268_v36  ;;  %179 = vmatmul.f32.vlgmr.msrb.gmra.mxu1 %v268_v36 }
 0x34d   :  { %v180_v38 = vpop.f32.mrf.mxu1 }
 0x34e   :  { %v183_v39 = vadd.f32 %v252_v37, %v180_v38 }
 0x350   :  { %269 = vtanh.f32 %v183_v39 }
 0x356   :  { %v270_v40 = vpop.eup %269 }
 0x357   :  { %253 = vst [vmem:[%s549_s2 + $0x28] sm:$0xff] %v270_v40  ;;  %205 = vmatmul.f32.vlgmr.msrb.gmra.mxu2 %v270_v40 }
 0x3da   :  { %v206_v42 = vpop.f32.mrf.mxu2 }
 0x3db   :  { %v209_v43 = vadd.f32 %v254_v41, %v206_v42 }
 0x3dd   :  { %271 = vtanh.f32 %v209_v43 }
 0x3e3   :  { %v272_v44 = vpop.eup %271 }
 0x3e4   :  { %255 = vst [vmem:[%s549_s2 + $0x30] sm:$0xff] %v272_v44  ;;  %231 = vmatmul.f32.vlgmr.msrb.gmra.mxu3 %v272_v44 }
 0x467   :  { %v232_v46 = vpop.f32.mrf.mxu3 }
 0x468   :  { %v235_v47 = vadd.f32 %v256_v45, %v232_v46 }
 0x46a   :  { %273 = vtanh.f32 %v235_v47 }
 0x470   :  { %v274_v48 = vpop.eup %273 }
 0x471   :  { %257 = vst [vmem:[%s549_s2 + $0x38] sm:$0xff] %v274_v48 }

</bundles_post_ra>
